<compile_context>
chip_gen: v7x
topology: tpu7x:2x2x1
jax: 0.10.0
libtpu: 0.0.40
codegen_flags: <defaults>
</compile_context>

<pallas_src>
import functools

import jax
import jax.numpy as jnp
from jax import lax
from jax.experimental import pallas as pl
from jax.experimental.pallas import tpu as pltpu


def _round_up(x, m):
    return (x + m - 1) // m * m


def _pick_batch_tile(batch):
    """Generation-aware batch tile (rows). Each [TB,*] operand pads its last dim to
    128 lanes in VMEM (~512 B/row for f32 logits + ~512 B/row for the int32 target
    column), double-buffered by the pipeline."""
    try:
        kind = jax.devices()[0].device_kind.lower()
    except Exception:  # pragma: no cover - defensive only
        kind = ""
    if "v5" in kind:
        cap = 8192        # v5e: stay friendly to the 16 MiB scoped-VMEM default
    elif "v6" in kind:
        cap = 16384       # v6e: 128 MiB physical VMEM, scoped limit raised below
    else:
        cap = 4096        # v7x (64 MiB VMEM/core) and unknown chips: conservative
    return min(cap, _round_up(batch, 8))


def _vmem_limit_bytes(tb, logits_itemsize):
    # Every [TB, *] operand pads its last dim to 128 lanes in VMEM; inputs are
    # double-buffered by the pipeline.  Alpha vector / outputs are negligible.
    lane = 128
    per_row = lane * (logits_itemsize + 4)       # logits + int32 targets (lane-padded)
    est = 2 * tb * per_row + (4 << 20)           # 2x double buffering + output/slack
    return int(min(max(est, 16 << 20), 100 << 20))


def _focal_loss_tile_kernel(gamma, batch, logits_ref, targets_ref, alpha_ref, out_ref):
    # logits_ref: [TB, C] native dtype; targets_ref: [TB, 1] int32;
    # alpha_ref: [1, C] f32 (per-class alpha, same block every tile);
    # out_ref: [1, 1, 128] f32 lane-dense partial sum for this tile.
    x = logits_ref[...].astype(jnp.float32)          # cast on the VPU; DMA stays narrow
    t = targets_ref[...]                             # [TB, 1]
    a_vec = alpha_ref[...]                           # [1, C]
    tb, c = x.shape

    col_ids = lax.broadcasted_iota(jnp.int32, (tb, c), 1)
    tmask = col_ids == t                             # [TB, C] one-hot target mask

    # Softmax cross-entropy pieces: single pass over the [TB, C] tile.
    m = jnp.max(x, axis=-1, keepdims=True)                                   # [TB, 1]
    sumexp = jnp.sum(jnp.exp(x - m), axis=-1, keepdims=True)                 # [TB, 1]
    # Gather x[target] via masked max (no one-hot multiply + second matmul-like pass).
    x_t = jnp.max(jnp.where(tmask, x, -jnp.inf), axis=-1, keepdims=True)     # [TB, 1]

    ce = (m - x_t) + jnp.log(sumexp)                                         # [TB, 1]
    pt = jnp.exp(-ce)                                 # exact, matches torch pt=exp(-ce)
    one_minus_pt = jnp.maximum(1.0 - pt, 0.0)

    g = float(gamma)  # static: specialize the modulation at trace time
    if g == 0.0:
        mod = jnp.ones_like(one_minus_pt)
    elif g == 1.0:
        mod = one_minus_pt
    elif g == 2.0:
        mod = one_minus_pt * one_minus_pt
    else:
        mod = jnp.power(one_minus_pt, jnp.float32(g))

    # In-kernel gather of alpha[target] (reuses tmask; no per-row alpha stream).
    a_t = jnp.sum(jnp.where(tmask, a_vec, 0.0), axis=-1, keepdims=True)      # [TB, 1]

    # Mask batch-padding rows against the static batch size.
    row_ids = lax.broadcasted_iota(jnp.int32, (tb, 1), 0) + pl.program_id(0) * tb
    focal = jnp.where(row_ids < batch, a_t * mod * ce, 0.0)                  # [TB, 1]

    partial = jnp.sum(focal).reshape(1, 1, 1)
    out_ref[...] = jnp.broadcast_to(partial, out_ref.shape)


def focal_loss(logits, targets, num_classes, gamma=1.0, alpha_type="dynamic",
               block_rows=None):
    """Pallas implementation of FocalLoss.forward.

    logits:  [B, C] float (any float dtype; streamed in native dtype)
    targets: [B] int
    returns: scalar float32 (mean focal loss)
    """
    B, C = logits.shape
    if C != num_classes:
        raise ValueError(f"Expected {num_classes} classes in input, got {C}")

    targets = targets.astype(jnp.int32)

    # Batch-global dynamic alpha is hoisted out of the kernel: it is a full-batch
    # statistic (torch.unique + counts) that cannot be computed per tile; as an
    # O(B*C) one-hot sum XLA fuses it trivially.
    if alpha_type == "dynamic":
        counts = jnp.sum(jax.nn.one_hot(targets, num_classes, dtype=jnp.float32), axis=0)
        alpha = jnp.where(counts > 0, 1.0 - counts / jnp.float32(B), 0.0)
    else:
        alpha = jnp.ones((num_classes,), jnp.float32)
    alpha_2d = alpha.astype(jnp.float32).reshape(1, num_classes)

    # Batch tiling (tile must be a sublane multiple; pad B up to a tile multiple).
    tb = block_rows if block_rows is not None else _pick_batch_tile(B)
    tb = max(8, _round_up(min(int(tb), _round_up(B, 8)), 8))
    padded_b = _round_up(B, tb)
    num_tiles = padded_b // tb

    pad = padded_b - B
    if pad:
        logits = jnp.pad(logits, ((0, pad), (0, 0)))   # finite values; rows masked in-kernel
        targets = jnp.pad(targets, (0, pad))           # class 0 (masked out anyway)

    targets_2d = targets.reshape(padded_b, 1)

    itemsize = jnp.dtype(logits.dtype).itemsize
    cost = pl.CostEstimate(
        flops=12 * padded_b * C,
        transcendentals=padded_b * (C + 3),
        bytes_accessed=(padded_b * (C * itemsize + 4)
                        + num_classes * 4
                        + num_tiles * 128 * 4),
    )

    partials = pl.pallas_call(
        functools.partial(_focal_loss_tile_kernel, float(gamma), int(B)),
        out_shape=jax.ShapeDtypeStruct((num_tiles, 1, 128), jnp.float32),
        grid=(num_tiles,),
        in_specs=[
            pl.BlockSpec((tb, C), lambda i: (i, 0)),   # logits, native dtype
            pl.BlockSpec((tb, 1), lambda i: (i, 0)),   # targets int32
            pl.BlockSpec((1, C), lambda i: (0, 0)),    # per-class alpha (constant block)
        ],
        out_specs=pl.BlockSpec((1, 1, 128), lambda i: (i, 0, 0)),
        compiler_params=pltpu.CompilerParams(
            dimension_semantics=("parallel",),
            vmem_limit_bytes=_vmem_limit_bytes(tb, itemsize),
        ),
        cost_estimate=cost,
    )(logits, targets_2d, alpha_2d)                    # no host-side upcast of logits

    return jnp.sum(partials[:, 0, 0]) / jnp.float32(B)


def _focal_loss_ref(logits, targets, num_classes, gamma=1.0):
    """Pure-JAX reference mirroring the PyTorch module."""
    B = logits.shape[0]
    counts = jnp.sum(jax.nn.one_hot(targets, num_classes), axis=0)
    alpha = jnp.where(counts > 0, 1.0 - counts / B, 0.0)
    logp = jax.nn.log_softmax(logits.astype(jnp.float32), axis=-1)
    ce = -jnp.take_along_axis(logp, targets[:, None], axis=-1)[:, 0]
    pt = jnp.exp(-ce)
    alpha_t = alpha[targets]
    focal = alpha_t * (1.0 - pt) ** gamma * ce
    return jnp.mean(focal)


if __name__ == "__main__":
    key = jax.random.PRNGKey(0)
    num_classes, gamma = 10, 1.0
    k1, k2, k3, k4 = jax.random.split(key, 4)

    # Case 1: small batch, f32 logits, single tile (matches the module's usage).
    B = 8
    logits = jax.random.normal(k1, (B, num_classes), dtype=jnp.float32)
    targets = jax.random.randint(k2, (B,), 0, num_classes, dtype=jnp.int32)
    loss = focal_loss(logits, targets, num_classes, gamma=gamma)
    jax.block_until_ready(loss)
    ref = _focal_loss_ref(logits, targets, num_classes, gamma=gamma)
    assert jnp.allclose(loss, ref, rtol=1e-3, atol=1e-5), (loss, ref)

    # Case 2: multi-tile grid with batch padding (B not a multiple of the tile).
    B2 = 1200
    logits2 = jax.random.normal(k3, (B2, num_classes), dtype=jnp.float32)
    targets2 = jax.random.randint(k4, (B2,), 0, num_classes, dtype=jnp.int32)
    loss2 = focal_loss(logits2, targets2, num_classes, gamma=gamma, block_rows=512)
    jax.block_until_ready(loss2)
    ref2 = _focal_loss_ref(logits2, targets2, num_classes, gamma=gamma)
    assert jnp.allclose(loss2, ref2, rtol=1e-3, atol=1e-5), (loss2, ref2)

    # Case 3: native bf16 logits (no host upcast; halves the dominant DMA bytes).
    loss_bf16 = focal_loss(logits2.astype(jnp.bfloat16), targets2, num_classes,
                           gamma=gamma, block_rows=512)
    jax.block_until_ready(loss_bf16)
    assert jnp.allclose(loss_bf16, ref2, rtol=5e-2, atol=1e-3), (loss_bf16, ref2)

    print("KERNEL_OK")
</pallas_src>

<mosaic_0001>
module attributes {stable_mosaic.version = 11 : i64} {
  func.func @_focal_loss_tile_kernel(%arg0: i32, %arg1: memref<8x10xf32, #tpu.memory_space<vmem>>, %arg2: memref<8x1xi32, #tpu.memory_space<vmem>>, %arg3: memref<1x10xf32, #tpu.memory_space<vmem>>, %arg4: memref<1x1x128xf32, #tpu.memory_space<vmem>>) attributes {dimension_semantics = [#tpu.dimension_semantics<parallel>], iteration_bounds = array<i64: 1>, scalar_prefetch = 0 : i64, scratch_operands = 0 : i64, tpu.core_type = #tpu.core_type<tc>, window_params = [{transform_indices = @transform_0, window_bounds = array<i64: 8, 10>}, {transform_indices = @transform_1, window_bounds = array<i64: 8, 1>}, {pipeline_mode = #tpu.pipeline_mode<synchronous>, transform_indices = @transform_2, window_bounds = array<i64: 1, 10>}, {transform_indices = @transform_3, window_bounds = array<i64: 1, 1, 128>}]} {
    %c0 = arith.constant 0 : index
    %c0_0 = arith.constant 0 : index
    %0 = vector.load %arg1[%c0, %c0_0] : memref<8x10xf32, #tpu.memory_space<vmem>>, vector<8x10xf32>
    %c0_1 = arith.constant 0 : index
    %c0_2 = arith.constant 0 : index
    %1 = vector.load %arg2[%c0_1, %c0_2] : memref<8x1xi32, #tpu.memory_space<vmem>>, vector<8x1xi32>
    %c0_3 = arith.constant 0 : index
    %c0_4 = arith.constant 0 : index
    %2 = vector.load %arg3[%c0_3, %c0_4] : memref<1x10xf32, #tpu.memory_space<vmem>>, vector<1x10xf32>
    %3 = tpu.iota {dimensions = array<i32: 1>} : vector<8x10xi32>
    %4 = vector.broadcast %1 : vector<8x1xi32> to vector<8x10xi32>
    %5 = arith.cmpi eq, %3, %4 : vector<8x10xi32>
    %cst = arith.constant dense<0xFF800000> : vector<8xf32>
    %6 = vector.multi_reduction <maximumf>, %0, %cst [1] : vector<8x10xf32> to vector<8xf32>
    %7 = vector.shape_cast %6 : vector<8xf32> to vector<8x1xf32>
    %8 = vector.broadcast %7 : vector<8x1xf32> to vector<8x10xf32>
    %9 = arith.subf %0, %8 : vector<8x10xf32>
    %10 = math.exp %9 : vector<8x10xf32>
    %cst_5 = arith.constant dense<0.000000e+00> : vector<8xf32>
    %11 = vector.multi_reduction <add>, %10, %cst_5 [1] : vector<8x10xf32> to vector<8xf32>
    %12 = vector.shape_cast %11 : vector<8xf32> to vector<8x1xf32>
    %cst_6 = arith.constant 0xFF800000 : f32
    %13 = vector.broadcast %cst_6 : f32 to vector<8x10xf32>
    %14 = arith.select %5, %0, %13 : vector<8x10xi1>, vector<8x10xf32>
    %cst_7 = arith.constant dense<0xFF800000> : vector<8xf32>
    %15 = vector.multi_reduction <maximumf>, %14, %cst_7 [1] : vector<8x10xf32> to vector<8xf32>
    %16 = vector.shape_cast %15 : vector<8xf32> to vector<8x1xf32>
    %17 = arith.subf %7, %16 : vector<8x1xf32>
    %18 = math.log %12 : vector<8x1xf32>
    %19 = arith.addf %17, %18 : vector<8x1xf32>
    %cst_8 = arith.constant 0.000000e+00 : f32
    %20 = vector.broadcast %cst_8 : f32 to vector<8x1xf32>
    %21 = arith.subf %20, %19 : vector<8x1xf32>
    %22 = math.exp %21 : vector<8x1xf32>
    %cst_9 = arith.constant 1.000000e+00 : f32
    %23 = vector.broadcast %cst_9 : f32 to vector<8x1xf32>
    %24 = arith.subf %23, %22 : vector<8x1xf32>
    %cst_10 = arith.constant 0.000000e+00 : f32
    %25 = vector.broadcast %cst_10 : f32 to vector<8x1xf32>
    %26 = arith.maximumf %24, %25 : vector<8x1xf32>
    %cst_11 = arith.constant 0.000000e+00 : f32
    %27 = vector.shape_cast %2 : vector<1x10xf32> to vector<1x10xf32>
    %28 = vector.broadcast %27 : vector<1x10xf32> to vector<8x10xf32>
    %29 = vector.broadcast %cst_11 : f32 to vector<8x10xf32>
    %30 = arith.select %5, %28, %29 : vector<8x10xi1>, vector<8x10xf32>
    %cst_12 = arith.constant dense<0.000000e+00> : vector<8xf32>
    %31 = vector.multi_reduction <add>, %30, %cst_12 [1] : vector<8x10xf32> to vector<8xf32>
    %32 = vector.shape_cast %31 : vector<8xf32> to vector<8x1xf32>
    %33 = tpu.iota {dimensions = array<i32: 0>} : vector<8x1xi32>
    %c8_i32 = arith.constant 8 : i32
    %34 = arith.muli %arg0, %c8_i32 : i32
    %35 = vector.broadcast %34 : i32 to vector<8x1xi32>
    %36 = arith.addi %33, %35 : vector<8x1xi32>
    %c8_i32_13 = arith.constant 8 : i32
    %37 = vector.broadcast %c8_i32_13 : i32 to vector<8x1xi32>
    %38 = arith.cmpi slt, %36, %37 : vector<8x1xi32>
    %39 = arith.mulf %32, %26 : vector<8x1xf32>
    %40 = arith.mulf %39, %19 : vector<8x1xf32>
    %cst_14 = arith.constant 0.000000e+00 : f32
    %41 = vector.broadcast %cst_14 : f32 to vector<8x1xf32>
    %42 = arith.select %38, %40, %41 : vector<8x1xi1>, vector<8x1xf32>
    %43 = vector.shape_cast %42 : vector<8x1xf32> to vector<1x8x1xf32>
    %cst_15 = arith.constant dense<0.000000e+00> : vector<1xf32>
    %44 = vector.multi_reduction <add>, %43, %cst_15 [1, 2] : vector<1x8x1xf32> to vector<1xf32>
    %45 = vector.shape_cast %44 : vector<1xf32> to vector<1x1x1xf32>
    %46 = vector.extract %45[0, 0, 0] : f32 from vector<1x1x1xf32>
    %47 = vector.broadcast %46 : f32 to vector<1x1x1xf32>
    %48 = vector.shape_cast %47 : vector<1x1x1xf32> to vector<1x1x1xf32>
    %49 = vector.broadcast %48 : vector<1x1x1xf32> to vector<1x1x128xf32>
    %c0_16 = arith.constant 0 : index
    %c0_17 = arith.constant 0 : index
    %c0_18 = arith.constant 0 : index
    %50 = vector.load %arg4[%c0_16, %c0_17, %c0_18] : memref<1x1x128xf32, #tpu.memory_space<vmem>>, vector<1x1x128xf32>
    tpu.vector_store %arg4[%c0_16, %c0_17, %c0_18], %49 {strides = array<i32>} : memref<1x1x128xf32, #tpu.memory_space<vmem>>, vector<1x1x128xf32>,
    return
  }
  func.func @transform_0(%arg0: i32) -> (i32, i32) {
    %c0_i32 = arith.constant 0 : i32
    %c0_i32_0 = arith.constant 0 : i32
    return %arg0, %c0_i32 : i32, i32
  }
  func.func @transform_1(%arg0: i32) -> (i32, i32) {
    %c0_i32 = arith.constant 0 : i32
    %c0_i32_0 = arith.constant 0 : i32
    return %arg0, %c0_i32 : i32, i32
  }
  func.func @transform_2(%arg0: i32) -> (i32, i32) {
    %c0_i32 = arith.constant 0 : i32
    %c0_i32_0 = arith.constant 0 : i32
    %c0_i32_1 = arith.constant 0 : i32
    return %c0_i32, %c0_i32_0 : i32, i32
  }
  func.func @transform_3(%arg0: i32) -> (i32, i32, i32) {
    %c0_i32 = arith.constant 0 : i32
    %c0_i32_0 = arith.constant 0 : i32
    %c0_i32_1 = arith.constant 0 : i32
    return %arg0, %c0_i32, %c0_i32_0 : i32, i32, i32
  }
}

</mosaic_0001>

<bundles_post_ra>
// kernel: tpu_custom_call.1
= control target key start
LH: loop header
LB: loop body
LE: loop exit
PB: predicated region body
PF: predicated region fallthrough
CT: control target
= control target key end

     0   :  { %vm24_vm0 = vcmask 80896   ;;  %s176_s0 = inlined_call_operand.vmem [shape: f32[8,10], index: 0, kind: input, shape index: {}]   ;;  %s177_s1 = inlined_call_operand.vmem [shape: s32[8,1], index: 1, kind: input, shape index: {}]   ;;  %s178_s2 = inlined_call_operand.vmem [shape: f32[1,10], index: 2, kind: input, shape index: {}]   ;;  %s179_s3 = inlined_call_operand.hbm [shape: f32[1,1,128], index: 3, kind: output, shape index: {}]  }
   0x1   :  { %v15_v0 = vld [vmem:[%s176_s0] sm:$0xff] }
   0x2   :  { %8 = vsyncpa [#allocation3], 0  ;;  %v25_v1 = vsel %vm24_vm0, %v15_v0, -inf  ;;  %v129_v2 = vmov 0   ;;  %v16_v3 = vld [vmem:[%s177_s1] sm:$0xff]  ;;  %v18_v7 = vlaneseq  ;;  %vm66_vm2 = vcmask 7168  }
   0x3   :  { %98 = vset.pattern.permute.xlu0 %v129_v2  ;;  %v93_v13 = vld [vmem:[%s178_s2] ss:$0 sm:$0xff]  ;;  %s130_s1 = smov [#allocation2]  }
   0x4   :  { %26 = vmax.xlane.f32.xlu0 %v25_v1  ;;  %v19_v8 = vand.u32 127, %v18_v7  ;;  %s85_s2 = sshll.u32 %s130_s1, 4  ;;  %s86_s2 = int_to_ptr.vmem [resolvable:$true] %s85_s2 }
   0x5   :  { %s105_s18 = scalar_lea.vmem %s86_s2, 16  ;;  %s109_s19 = scalar_lea.vmem %s86_s2, 32 }
   0x6   :  { %p106_p0 = scmp.ne.s32.totalorder %s86_s2, %s105_s18  ;;  %p110_p1 = scmp.lt.s32.totalorder %s86_s2, %s86_s2 }
   0x7   :  { %p111_p2 = scmp.lt.s32.totalorder %s109_s19, %s105_s18 }
   0x9   :  { %p112_p3 = por %p111_p2, %p110_p1 }
   0xb   :  { %p113_p4 = pnand %p112_p3, %p106_p0 }
  0x1a   :  { %21 = vperm.xlu0 %98, %v16_v3  }
  0x91   :  { %v27_v4 = vpop.xlane.xlu0 %26 }
  0x92   :  { %v28_v5 = vsub.f32 %v15_v0, %v27_v4 }
  0x94   :  { %v29_v6 = vmul.f32 1.442695, %v28_v5 }
  0x96   :  { %99 = vpow2.f32 %v29_v6 }
  0x99   :  { %v22_v9 = vpop.permute.xlu0 %21 }
  0x9a   :  { %vm23_vm1 = vcmp.eq.s32.totalorder %v19_v8, %v22_v9 }
  0x9b   :  { %v34_v11 = vsel %vm23_vm1, %v15_v0, -inf  ;;  %v53_v15 = vsel %vm23_vm1, %v93_v13, 0.0 }
  0x9c   :  { %v35_v14 = vsel %vm24_vm0, %v34_v11, -inf  ;;  %v54_v16 = vsel %vm24_vm0, %v53_v15, 0.0 }
  0xa0   :  { %v100_v10 = vpop.eup %99 }
  0xa1   :  { %v31_v12 = vsel %vm24_vm0, %v100_v10, 0.0 }
  0xa2   :  { %32 = vadd.xlane.f32.xlu1 %v31_v12 }
  0xa6   :  { %36 = vmax.xlane.f32.xlu1 %v35_v14 }
  0xaa   :  { %55 = vadd.xlane.f32.xlu1 %v54_v16 }
 0x12f   :  { %v33_v17 = vpop.xlane.xlu1 %32 }
 0x130   :  { %101 = vlog2.f32 %v33_v17 }
 0x133   :  { %v37_v18 = vpop.xlane.xlu1 %36 }
 0x134   :  { %v38_v21 = vsub.f32 %v27_v4, %v37_v18 }
 0x137   :  { %v56_v28 = vpop.xlane.xlu1 %55 }
 0x13a   :  { %v102_v19 = vpop.eup %101 }
 0x13b   :  { %v40_v20 = vmul.f32 0.6931472, %v102_v19 }
 0x13d   :  { %v41_v22 = vadd.f32 %v40_v20, %v38_v21 }
 0x13f   :  { %v42_v23 = vsub.f32 0.0, %v41_v22 }
 0x141   :  { %v43_v24 = vmul.f32 1.442695, %v42_v23 }
 0x143   :  { %103 = vpow2.f32 %v43_v24 }
 0x14d   :  { %v104_v25 = vpop.eup %103 }
 0x14e   :  { %v45_v26 = vsub.f32 1.0, %v104_v25 }
 0x150   :  { %v46_v27 = vmax.f32 %v45_v26, 0.0 }
 0x152   :  { %v63_v29 = vmul.f32 %v56_v28, %v46_v27 }
 0x154   :  { %v64_v30 = vmul.f32 %v63_v29, %v41_v22 }
 0x156   :  { %v67_v31 = vsel %vm66_vm2, %v64_v30, 0.0 }
 0x157   :  { %68 = vadd.xlane.f32.xlu1 %v67_v31 }
 0x1e4   :  { %v69_v32 = vpop.xlane.xlu1 %68 }
 0x1e5   :  { %v70_v33 = vrot.slane %v69_v32, 4 }
 0x1e7   :  { %v71_v34 = vadd.f32 %v70_v33, %v69_v32 }
 0x1e9   :  { %v72_v35 = vrot.slane %v71_v34, 2 }
 0x1eb   :  { %v73_v36 = vadd.f32 %v72_v35, %v71_v34 }
 0x1ed   :  { %v74_v37 = vrot.slane %v73_v36, 1 }
 0x1ef   :  { %v75_v38 = vadd.f32 %v74_v37, %v73_v36 }
 0x1f1   :  { %94 = vpush %v75_v38 }
 0x222   :  { %s95_s17 = spop %94 }
 0x223   :  { %v77_v39 = vstv %s95_s17 }
 0x224   :  { %78 = vst [vmem:[#allocation2] sm:$0x1] %v77_v39 }
 0x225   :  { %116 = shalt.err (!%p113_p4)
}
 0x226   :  { %s117_s22 = scalar_lea.hbm %s179_s3, 16 }
 0x227   :  { %p118_p5 = scmp.ne.s32.totalorder %s179_s3, %s117_s22  ;;  %p121_p6 = scmp.lt.u32.totalorder %s117_s22, %s179_s3 }
 0x229   :  { %p123_p7 = pnand %p121_p6, %p118_p5 }
 0x22b   :  { %126 = shalt.err (!%p123_p7)
}
 0x22c   :  { %88 = dma.vmem_to_hbm [thread:$0]  %s86_s2, 16, %s179_s3, [#allocation3]  }
 0x22d   :  { %127 = dma.done.wait [#allocation3], 16  }
 0x22e   :  { %128 = vsyncadd [#allocation3], 4294967280 }
 0x22f   :  { %92 = vsyncpa [#allocation3], 1 }

</bundles_post_ra>
